<compile_context>
chip_gen: v6e
topology: v6e:2x2x1
jax: 0.10.0
libtpu: 0.0.40
codegen_flags: <defaults>
</compile_context>

<pallas_src>
import math

import jax
import jax.numpy as jnp
from jax.experimental import pallas as pl
from jax.experimental.pallas import tpu as pltpu

_LANE = 128
_WIDTH_CANDIDATES = (4096, 2048, 1024, 512, 256, 128)


def _copy_kernel(x_ref, o_ref):
    # Pure lane-dense copy of one (tb, tc) tile.  No reshape, no relayout.
    o_ref[...] = x_ref[...]


def _cdiv(a, b):
    return -(-a // b)


def _round_up(a, b):
    return _cdiv(a, b) * b


def _sublane_multiple(dtype):
    """Packed-sublane tile: 8 rows for 4-byte, 16 for 2-byte, 32 for 1-byte."""
    itemsize = jnp.dtype(dtype).itemsize
    return max(8, 32 // max(itemsize, 1))


def _hw_budgets():
    """Generation-aware (block_target_bytes, vmem_limit_bytes)."""
    vmem = None
    try:
        info = pltpu.get_tpu_info()
        for name in ("vmem_capacity_bytes", "vmem_size_bytes", "vmem_bytes"):
            v = getattr(info, name, None)
            if isinstance(v, int) and v > 0:
                vmem = v
                break
    except Exception:
        vmem = None
    if vmem is not None and vmem >= 100 * 1024 * 1024:
        # v5e / v6e: 128 MiB physical VMEM -> bigger blocks, fewer grid steps.
        return 8 * 1024 * 1024, 64 * 1024 * 1024
    # v7x (64 MiB per TC) or unknown: conservative, still double-buffered.
    return 4 * 1024 * 1024, 32 * 1024 * 1024


def _pick_slab(total, n, flat, sublane):
    """Lane-dense copy shape (R, C); falls back to (n, flat) if total % 128 != 0."""
    if total % _LANE == 0:
        divisors = [c for c in _WIDTH_CANDIDATES if total % c == 0]
        preferred = [c for c in divisors if total // c >= sublane]
        c = preferred[0] if preferred else divisors[0]
        return total // c, c
    return n, flat


def _pick_tiles(rows, cols, itemsize, sublane, target_bytes):
    """Block shape (tb, tc) under the byte budget, (8,128)-legal, >=2 grid steps
    when there is enough work (so both v7x TensorCores get a share)."""
    # Column tile: full extent if it fits, else a large multiple of 128.
    if cols <= _LANE or cols * itemsize * sublane <= target_bytes:
        tc = cols
    else:
        tc = max(_LANE,
                 (target_bytes // (sublane * itemsize)) // _LANE * _LANE)
        tc = min(tc, (cols // _LANE) * _LANE)

    # Row tile: multiple of the packed-sublane tile, or the full extent.
    if rows <= sublane:
        tb = rows
    else:
        tb = max(sublane,
                 (target_bytes // (tc * itemsize)) // sublane * sublane)
        tb = min(tb, _round_up(rows, sublane))
        if _cdiv(cols, tc) == 1 and tb >= rows:
            # Single-block grid would idle one v7x TensorCore: split rows.
            tb = max(sublane, _round_up(_cdiv(rows, 2), sublane))
    return tb, tc


def flatten_last(x, d=2):
    """Pallas implementation of FlattenLast(d): reshape the last d+1 dims."""
    assert x.ndim >= d + 1, "need at least d+1 dims to flatten"
    lead = x.shape[: x.ndim - (d + 1)]
    flat = int(math.prod(x.shape[x.ndim - (d + 1):]))
    n = int(math.prod(lead)) if lead else 1
    total = n * flat
    out_shape = (*lead, flat)

    if total == 0:
        return x.reshape(out_shape)

    itemsize = jnp.dtype(x.dtype).itemsize
    sublane = _sublane_multiple(x.dtype)
    target_bytes, vmem_limit = _hw_budgets()

    rows, cols = _pick_slab(total, n, flat, sublane)
    tb, tc = _pick_tiles(rows, cols, itemsize, sublane, target_bytes)

    # Metadata-only re-view of the contiguous buffer into the copy slab.
    x2 = x.reshape(rows, cols)
    grid = (_cdiv(rows, tb), _cdiv(cols, tc))

    out2 = pl.pallas_call(
        _copy_kernel,
        out_shape=jax.ShapeDtypeStruct((rows, cols), x.dtype),
        grid_spec=pltpu.PrefetchScalarGridSpec(
            num_scalar_prefetch=0,
            grid=grid,
            in_specs=[pl.BlockSpec((tb, tc), lambda i, j: (i, j))],
            out_specs=pl.BlockSpec((tb, tc), lambda i, j: (i, j)),
        ),
        compiler_params=pltpu.CompilerParams(
            dimension_semantics=("parallel", "parallel"),
            vmem_limit_bytes=vmem_limit,
        ),
        cost_estimate=pl.CostEstimate(
            flops=0,
            transcendentals=0,
            bytes_accessed=2 * total * itemsize,
        ),
    )(x2)

    # Restore the logical output shape (metadata-only).
    return out2.reshape(out_shape)


if __name__ == "__main__":
    key = jax.random.PRNGKey(0)

    # Primary example: small NCHW conv-feature-like input (d=2).
    x = jax.random.normal(key, (2, 4, 16, 16), dtype=jnp.float32)
    out = jax.block_until_ready(flatten_last(x, d=2))
    assert out.shape == (2, 4 * 16 * 16), out.shape
    assert out.dtype == x.dtype
    assert jnp.array_equal(out, x.reshape(2, -1)), "mismatch (case 1)"

    # Multi-step grid with a partial last row block (slab R=10, tb=8).
    x2 = jax.random.normal(jax.random.PRNGKey(1), (10, 4, 16, 16),
                           dtype=jnp.float32)
    out2 = jax.block_until_ready(flatten_last(x2, d=2))
    assert jnp.array_equal(out2, x2.reshape(10, -1)), "mismatch (case 2)"

    # bf16: dtype-aware packed-sublane tile.
    x3 = jax.random.normal(jax.random.PRNGKey(2), (16, 8, 16, 16),
                           dtype=jnp.bfloat16)
    out3 = jax.block_until_ready(flatten_last(x3, d=2))
    assert jnp.array_equal(out3, x3.reshape(16, -1)), "mismatch (case 3)"

    # Fallback path: total not a multiple of 128 (full-extent block, still exact).
    x4 = jax.random.normal(jax.random.PRNGKey(3), (2, 3, 5, 7),
                           dtype=jnp.float32)
    out4 = jax.block_until_ready(flatten_last(x4, d=2))
    assert jnp.array_equal(out4, x4.reshape(2, -1)), "mismatch (case 4)"

    # Empty leading dims: d=3 on a 4D tensor -> 1D output.
    out5 = jax.block_until_ready(flatten_last(x, d=3))
    assert out5.shape == (2 * 4 * 16 * 16,)
    assert jnp.array_equal(out5, x.reshape(-1)), "mismatch (case 5)"

    print("KERNEL_OK")
</pallas_src>

<mosaic_0001>
module attributes {stable_mosaic.version = 11 : i64} {
  func.func @_copy_kernel(%arg0: i32, %arg1: i32, %arg2: memref<8x256xf32, #tpu.memory_space<vmem>>, %arg3: memref<8x256xf32, #tpu.memory_space<vmem>>) attributes {dimension_semantics = [#tpu.dimension_semantics<parallel>, #tpu.dimension_semantics<parallel>], iteration_bounds = array<i64: 1, 1>, scalar_prefetch = 0 : i64, scratch_operands = 0 : i64, tpu.core_type = #tpu.core_type<tc>, window_params = [{transform_indices = @transform_0, window_bounds = array<i64: 8, 256>}, {transform_indices = @transform_1, window_bounds = array<i64: 8, 256>}]} {
    %c0 = arith.constant 0 : index
    %c0_0 = arith.constant 0 : index
    %0 = vector.load %arg2[%c0, %c0_0] : memref<8x256xf32, #tpu.memory_space<vmem>>, vector<8x256xf32>
    %c0_1 = arith.constant 0 : index
    %c0_2 = arith.constant 0 : index
    %1 = vector.load %arg3[%c0_1, %c0_2] : memref<8x256xf32, #tpu.memory_space<vmem>>, vector<8x256xf32>
    tpu.vector_store %arg3[%c0_1, %c0_2], %0 {strides = array<i32>} : memref<8x256xf32, #tpu.memory_space<vmem>>, vector<8x256xf32>,
    return
  }
  func.func @transform_0(%arg0: i32, %arg1: i32) -> (i32, i32) {
    %c0_i32 = arith.constant 0 : i32
    return %arg0, %arg1 : i32, i32
  }
  func.func @transform_1(%arg0: i32, %arg1: i32) -> (i32, i32) {
    %c0_i32 = arith.constant 0 : i32
    return %arg0, %arg1 : i32, i32
  }
}

</mosaic_0001>

<bundles_post_ra>
// kernel: tpu_custom_call.1
= control target key start
LH: loop header
LB: loop body
LE: loop exit
PB: predicated region body
PF: predicated region fallthrough
CT: control target
= control target key end

     0   :  { %6 = vsyncpa [#allocation3], 0  ;;  %s104_s0 = inlined_call_operand.hbm [shape: f32[8,256], index: 0, kind: input, shape index: {}]   ;;  %s105_s1 = inlined_call_operand.hbm [shape: f32[8,256], index: 1, kind: output, shape index: {}]  }
   0x1   :  { %7 = vsyncpa [#allocation4], 0  ;;  %s86_s6 = smov [#allocation2]  }
   0x2   :  { %s14_s7 = sshll.u32 %s86_s6, 4  ;;  %s15_s7 = int_to_ptr.vmem [resolvable:$true] %s14_s7 }
   0x3   :  { %s50_s8 = scalar_lea.vmem %s15_s7, 256  ;;  %p55_p1 = scmp.lt.s32.totalorder %s15_s7, %s15_s7 }
   0x4   :  { %p51_p0 = scmp.ne.s32.totalorder %s15_s7, %s50_s8  ;;  %p56_p2 = scmp.lt.s32.totalorder %s50_s8, %s50_s8 }
   0x6   :  { %p57_p3 = por %p56_p2, %p55_p1 }
   0x8   :  { %p58_p4 = pnand %p57_p3, %p51_p0 }
   0xa   :  { %61 = shalt.err (!%p58_p4)
}
   0xb   :  { %17 = dma.hbm_to_vmem [thread:$0]  %s104_s0, 256, %s15_s7, [#allocation3]  }
   0xc   :  { %82 = dma.done.wait [#allocation3], 256  }
   0xd   :  { %83 = vsyncadd [#allocation3], 4294967040  ;;  %s87_s11 = smov [#allocation5]   ;;  %v21_v0 = vld [vmem:[#allocation2] sm:$0xff]  ;;  %v22_v1 = vld [vmem:[#allocation2 + $0x8] sm:$0xff] }
   0xe   :  { %s31_s12 = sshll.u32 %s87_s11, 4  ;;  %23 = vst [vmem:[#allocation5] sm:$0xff] %v21_v0  ;;  %24 = vst [vmem:[#allocation5 + $0x8] sm:$0xff] %v22_v1  ;;  %s32_s12 = int_to_ptr.vmem [resolvable:$true] %s31_s12 }
   0xf   :  { %s62_s13 = scalar_lea.vmem %s32_s12, 256  ;;  %p67_p6 = scmp.lt.s32.totalorder %s32_s12, %s32_s12 }
  0x10   :  { %p63_p5 = scmp.ne.s32.totalorder %s32_s12, %s62_s13  ;;  %p68_p7 = scmp.lt.s32.totalorder %s62_s13, %s62_s13 }
  0x12   :  { %p69_p8 = por %p68_p7, %p67_p6 }
  0x14   :  { %p70_p9 = pnand %p69_p8, %p63_p5 }
  0x16   :  { %73 = shalt.err (!%p70_p9)
}
  0x17   :  { %34 = dma.vmem_to_hbm [thread:$0]  %s32_s12, 256, %s105_s1, [#allocation4]  }
  0x18   :  { %84 = dma.done.wait [#allocation4], 256  }
  0x19   :  { %85 = vsyncadd [#allocation4], 4294967040 }
  0x1a   :  { %38 = vsyncpa [#allocation3], 1 }
  0x1b   :  { %39 = vsyncpa [#allocation4], 1 }

</bundles_post_ra>
